<compile_context>
chip_gen: v7x
topology: tpu7x:2x2x1
jax: 0.10.0
libtpu: 0.0.40
codegen_flags: <defaults>
</compile_context>

<pallas_src>
import jax
import jax.numpy as jnp
from jax.experimental import pallas as pl
from jax.experimental.pallas import tpu as pltpu

_SUBLANE = 8
_LANE = 128


def _round_up(x: int, m: int) -> int:
    return ((x + m - 1) // m) * m


def _my_loss_kernel(pred_ref, label_ref, ub_ref, out_ref):
    j = pl.program_id(1)

    # Output block is resident across the (arbitrary) column axis -> it is the
    # per-row-block accumulator.  Zero it on the first column step.
    @pl.when(j == 0)
    def _():
        out_ref[...] = jnp.zeros_like(out_ref)

    pred = pred_ref[...]
    label = label_ref[...]
    ub = ub_ref[...]
    if pred.dtype != jnp.float32:  # upcast only when needed; accumulate in f32
        pred = pred.astype(jnp.float32)
        label = label.astype(jnp.float32)
        ub = ub.astype(jnp.float32)

    diff = pred - label
    delta = pred - ub
    hinge = jnp.where(delta > 0, delta, jnp.float32(0.0))
    terms = diff * diff + 0.5 * (hinge * hinge)

    bm, bn = terms.shape
    # (bm, bn) -> (bm//8, 8, bn) splits the row axis exactly at the (8, 128)
    # tile boundary: layout-preserving, and the axis-0 sum is pure vreg adds.
    partial = terms.reshape(bm // _SUBLANE, _SUBLANE, bn).sum(axis=0)  # (8, bn)
    # Fold lane-groups with 128-aligned slices (whole-vreg adds, no relayout).
    red = partial[:, 0:_LANE]
    for g in range(1, bn // _LANE):
        red = red + partial[:, g * _LANE:(g + 1) * _LANE]
    out_ref[...] += red[None, :, :]


def my_loss(pred, labels, upper_bounds, *, target_tile_bytes=2 << 20):
    assert pred.shape == labels.shape == upper_bounds.shape
    total = pred.size

    # Elementwise + global mean -> layout agnostic; collapse to 2-D (rows, lanes).
    if pred.ndim < 2:
        pred, labels, upper_bounds = (x.reshape(1, -1) for x in (pred, labels, upper_bounds))
    elif pred.ndim > 2:
        n_last = pred.shape[-1]
        pred, labels, upper_bounds = (x.reshape(-1, n_last) for x in (pred, labels, upper_bounds))
    M, N = pred.shape

    # Tile sizing: big streaming tiles (~2 MiB per input), lane dim capped at 2048
    # so VMEM use stays bounded for arbitrarily wide inputs.
    bn = min(_round_up(N, _LANE), 2048)
    bm = max(_SUBLANE, (target_tile_bytes // (bn * 4)) // _SUBLANE * _SUBLANE)
    bm = min(bm, _round_up(M, _SUBLANE))

    M_pad = _round_up(M, bm)
    N_pad = _round_up(N, bn)
    if (M_pad, N_pad) != (M, N):
        pad = ((0, M_pad - M), (0, N_pad - N))
        # Zero padding contributes exactly 0 to the loss sum.
        pred = jnp.pad(pred, pad)
        labels = jnp.pad(labels, pad)
        upper_bounds = jnp.pad(upper_bounds, pad)

    n_row_blocks = M_pad // bm
    n_col_blocks = N_pad // bn

    in_spec = pl.BlockSpec((bm, bn), lambda i, j: (i, j))
    out_spec = pl.BlockSpec((1, _SUBLANE, _LANE), lambda i, j: (i, 0, 0))

    partials = pl.pallas_call(
        _my_loss_kernel,
        out_shape=jax.ShapeDtypeStruct((n_row_blocks, _SUBLANE, _LANE), jnp.float32),
        grid_spec=pltpu.PrefetchScalarGridSpec(
            num_scalar_prefetch=0,
            grid=(n_row_blocks, n_col_blocks),
            in_specs=[in_spec, in_spec, in_spec],
            out_specs=out_spec,
        ),
        compiler_params=pltpu.CompilerParams(
            # Row-block axis is independent (shards across both TCs on v7x);
            # column axis carries the resident output-block accumulator.
            dimension_semantics=("parallel", "arbitrary"),
            vmem_limit_bytes=32 << 20,
        ),
    )(pred, labels, upper_bounds)

    return 0.5 * jnp.sum(partials) / jnp.float32(total)


def my_loss_ref(pred, labels, upper_bounds):
    delta = pred - upper_bounds
    return 0.5 * jnp.mean(
        (pred - labels) ** 2 + 0.5 * jnp.where(delta > 0, delta, 0.0) ** 2
    )


if __name__ == "__main__":
    key = jax.random.PRNGKey(0)
    k1, k2, k3, k4, k5, k6 = jax.random.split(key, 6)

    # Case 1: aligned 2-D batch.
    M, N = 64, 256
    pred = jax.random.normal(k1, (M, N), dtype=jnp.float32)
    labels = jax.random.normal(k2, (M, N), dtype=jnp.float32)
    ubs = jax.random.normal(k3, (M, N), dtype=jnp.float32)
    out = my_loss(pred, labels, ubs)
    jax.block_until_ready(out)
    ref = my_loss_ref(pred, labels, ubs)
    assert jnp.allclose(out, ref, rtol=1e-5, atol=1e-6), (out, ref)

    # Case 2: ragged 1-D batch (exercises the zero-padding path).
    B = 200
    pred1 = jax.random.normal(k4, (B,), dtype=jnp.float32)
    labels1 = jax.random.normal(k5, (B,), dtype=jnp.float32)
    ubs1 = jax.random.normal(k6, (B,), dtype=jnp.float32)
    out1 = my_loss(pred1, labels1, ubs1)
    jax.block_until_ready(out1)
    ref1 = my_loss_ref(pred1, labels1, ubs1)
    assert jnp.allclose(out1, ref1, rtol=1e-5, atol=1e-6), (out1, ref1)

    print("KERNEL_OK")
</pallas_src>

<mosaic_0001>
module attributes {stable_mosaic.version = 11 : i64} {
  func.func @_my_loss_kernel(%arg0: i32, %arg1: i32, %arg2: memref<64x256xf32, #tpu.memory_space<vmem>>, %arg3: memref<64x256xf32, #tpu.memory_space<vmem>>, %arg4: memref<64x256xf32, #tpu.memory_space<vmem>>, %arg5: memref<1x8x128xf32, #tpu.memory_space<vmem>>) attributes {dimension_semantics = [#tpu.dimension_semantics<parallel>, #tpu.dimension_semantics<arbitrary>], iteration_bounds = array<i64: 1, 1>, scalar_prefetch = 0 : i64, scratch_operands = 0 : i64, tpu.core_type = #tpu.core_type<tc>, window_params = [{transform_indices = @transform_0, window_bounds = array<i64: 64, 256>}, {transform_indices = @transform_1, window_bounds = array<i64: 64, 256>}, {transform_indices = @transform_2, window_bounds = array<i64: 64, 256>}, {transform_indices = @transform_3, window_bounds = array<i64: 1, 8, 128>}]} {
    %c0_i32 = arith.constant 0 : i32
    %0 = arith.cmpi eq, %arg1, %c0_i32 : i32
    %1 = arith.extui %0 : i1 to i32
    %c0_i32_0 = arith.constant 0 : i32
    %2 = arith.cmpi ne, %1, %c0_i32_0 : i32
    scf.if %2 {
      %cst_15 = arith.constant 0.000000e+00 : f32
      %26 = vector.broadcast %cst_15 : f32 to vector<1x8x128xf32>
      %c0_16 = arith.constant 0 : index
      %c0_17 = arith.constant 0 : index
      %c0_18 = arith.constant 0 : index
      %27 = vector.load %arg5[%c0_16, %c0_17, %c0_18] : memref<1x8x128xf32, #tpu.memory_space<vmem>>, vector<1x8x128xf32>
      tpu.vector_store %arg5[%c0_16, %c0_17, %c0_18], %26 {strides = array<i32>} : memref<1x8x128xf32, #tpu.memory_space<vmem>>, vector<1x8x128xf32>,
    } else {
    }
    %c0 = arith.constant 0 : index
    %c0_1 = arith.constant 0 : index
    %3 = vector.load %arg2[%c0, %c0_1] : memref<64x256xf32, #tpu.memory_space<vmem>>, vector<64x256xf32>
    %c0_2 = arith.constant 0 : index
    %c0_3 = arith.constant 0 : index
    %4 = vector.load %arg3[%c0_2, %c0_3] : memref<64x256xf32, #tpu.memory_space<vmem>>, vector<64x256xf32>
    %c0_4 = arith.constant 0 : index
    %c0_5 = arith.constant 0 : index
    %5 = vector.load %arg4[%c0_4, %c0_5] : memref<64x256xf32, #tpu.memory_space<vmem>>, vector<64x256xf32>
    %6 = arith.subf %3, %4 : vector<64x256xf32>
    %7 = arith.subf %3, %5 : vector<64x256xf32>
    %cst = arith.constant 0.000000e+00 : f32
    %8 = vector.broadcast %cst : f32 to vector<64x256xf32>
    %9 = arith.cmpf ogt, %7, %8 : vector<64x256xf32>
    %cst_6 = arith.constant 0.000000e+00 : f32
    %10 = vector.broadcast %cst_6 : f32 to vector<64x256xf32>
    %11 = arith.select %9, %7, %10 : vector<64x256xi1>, vector<64x256xf32>
    %12 = arith.mulf %6, %6 : vector<64x256xf32>
    %13 = arith.mulf %11, %11 : vector<64x256xf32>
    %cst_7 = arith.constant 5.000000e-01 : f32
    %14 = vector.broadcast %cst_7 : f32 to vector<64x256xf32>
    %15 = arith.mulf %14, %13 : vector<64x256xf32>
    %16 = arith.addf %12, %15 : vector<64x256xf32>
    %17 = vector.shape_cast %16 : vector<64x256xf32> to vector<8x8x256xf32>
    %cst_8 = arith.constant dense<0.000000e+00> : vector<8x256xf32>
    %18 = vector.multi_reduction <add>, %17, %cst_8 [0] : vector<8x8x256xf32> to vector<8x256xf32>
    %19 = vector.extract_strided_slice %18 {offsets = [0, 0], sizes = [8, 128], strides = [1, 1]} : vector<8x256xf32> to vector<8x128xf32>
    %20 = vector.extract_strided_slice %18 {offsets = [0, 128], sizes = [8, 128], strides = [1, 1]} : vector<8x256xf32> to vector<8x128xf32>
    %21 = arith.addf %19, %20 : vector<8x128xf32>
    %c0_9 = arith.constant 0 : index
    %c0_10 = arith.constant 0 : index
    %c0_11 = arith.constant 0 : index
    %22 = vector.load %arg5[%c0_9, %c0_10, %c0_11] : memref<1x8x128xf32, #tpu.memory_space<vmem>>, vector<1x8x128xf32>
    %23 = vector.shape_cast %21 : vector<8x128xf32> to vector<1x8x128xf32>
    %24 = arith.addf %22, %23 : vector<1x8x128xf32>
    %c0_12 = arith.constant 0 : index
    %c0_13 = arith.constant 0 : index
    %c0_14 = arith.constant 0 : index
    %25 = vector.load %arg5[%c0_12, %c0_13, %c0_14] : memref<1x8x128xf32, #tpu.memory_space<vmem>>, vector<1x8x128xf32>
    tpu.vector_store %arg5[%c0_12, %c0_13, %c0_14], %24 {strides = array<i32>} : memref<1x8x128xf32, #tpu.memory_space<vmem>>, vector<1x8x128xf32>,
    return
  }
  func.func @transform_0(%arg0: i32, %arg1: i32) -> (i32, i32) {
    %c0_i32 = arith.constant 0 : i32
    return %arg0, %arg1 : i32, i32
  }
  func.func @transform_1(%arg0: i32, %arg1: i32) -> (i32, i32) {
    %c0_i32 = arith.constant 0 : i32
    return %arg0, %arg1 : i32, i32
  }
  func.func @transform_2(%arg0: i32, %arg1: i32) -> (i32, i32) {
    %c0_i32 = arith.constant 0 : i32
    return %arg0, %arg1 : i32, i32
  }
  func.func @transform_3(%arg0: i32, %arg1: i32) -> (i32, i32, i32) {
    %c0_i32 = arith.constant 0 : i32
    %c0_i32_0 = arith.constant 0 : i32
    %c0_i32_1 = arith.constant 0 : i32
    return %arg0, %c0_i32, %c0_i32_0 : i32, i32, i32
  }
}

</mosaic_0001>

<bundles_post_ra>
// kernel: tpu_custom_call.1
= control target key start
LH: loop header
LB: loop body
LE: loop exit
PB: predicated region body
PF: predicated region fallthrough
CT: control target
= control target key end

     0   :  { %8 = vsyncpa [#allocation3], 0  ;;  %s538_s0 = inlined_call_operand.hbm [shape: f32[64,256], index: 0, kind: input, shape index: {}]   ;;  %s539_s1 = inlined_call_operand.hbm [shape: f32[64,256], index: 1, kind: input, shape index: {}]   ;;  %s540_s2 = inlined_call_operand.hbm [shape: f32[64,256], index: 2, kind: input, shape index: {}]   ;;  %s541_s3 = inlined_call_operand.hbm [shape: f32[1,8,128], index: 3, kind: output, shape index: {}]  }
   0x1   :  { %9 = vsyncpa [#allocation6], 0 }
   0x2   :  { %10 = vsyncpa [#allocation4], 0  ;;  %s372_s12 = smov [#allocation5]   ;;  %s373_s14 = smov [#allocation2]  }
   0x3   :  { %s28_s13 = sshll.u32 %s372_s12, 4  ;;  %s16_s15 = sshll.u32 %s373_s14, 4  ;;  %s29_s13 = int_to_ptr.vmem [resolvable:$true] %s28_s13  ;;  %s398_s15 = int_to_ptr.vmem [resolvable:$true] %s16_s15 }
   0x4   :  { %s278_s18 = scalar_lea.hbm %s539_s1, 2048 }
   0x5   :  { %p279_p0 = scmp.ne.s32.totalorder %s539_s1, %s278_s18  ;;  %p282_p1 = scmp.lt.u32.totalorder %s278_s18, %s539_s1 }
   0x7   :  { %p284_p2 = pnand %p282_p1, %p279_p0 }
   0x9   :  { %287 = shalt.err (!%p284_p2)
}
   0xa   :  { %s288_s23 = scalar_lea.vmem %s29_s13, 2048  ;;  %p293_p4 = scmp.lt.s32.totalorder %s29_s13, %s29_s13 }
   0xb   :  { %p289_p3 = scmp.ne.s32.totalorder %s29_s13, %s288_s23  ;;  %p294_p5 = scmp.lt.s32.totalorder %s288_s23, %s288_s23 }
   0xd   :  { %p295_p6 = por %p294_p5, %p293_p4 }
   0xf   :  { %p296_p7 = pnand %p295_p6, %p289_p3 }
  0x11   :  { %299 = shalt.err (!%p296_p7)
}
  0x12   :  { %s374_s24 = smov 256   ;;  %s375_s25 = smov 16  }
  0x13   :  { %34 = dma.hbm_to_vmem [thread:$0]  %s539_s1, 2048, %s29_s13, [#allocation6], %s374_s24, %s374_s24, %s375_s25  }
  0x14   :  { %s300_s30 = scalar_lea.hbm %s538_s0, 2048 }
  0x15   :  { %p301_p8 = scmp.ne.s32.totalorder %s538_s0, %s300_s30  ;;  %p304_p9 = scmp.lt.u32.totalorder %s300_s30, %s538_s0 }
  0x17   :  { %p306_p10 = pnand %p304_p9, %p301_p8 }
  0x19   :  { %309 = shalt.err (!%p306_p10)
}
  0x1a   :  { %s310_s8 = scalar_lea.vmem %s398_s15, 2048  ;;  %p315_p12 = scmp.lt.s32.totalorder %s398_s15, %s398_s15 }
  0x1b   :  { %p311_p11 = scmp.ne.s32.totalorder %s398_s15, %s310_s8  ;;  %p316_p13 = scmp.lt.s32.totalorder %s310_s8, %s310_s8 }
  0x1d   :  { %p317_p0 = por %p316_p13, %p315_p12 }
  0x1f   :  { %p318_p1 = pnand %p317_p0, %p311_p11 }
  0x21   :  { %321 = shalt.err (!%p318_p1)
}
  0x22   :  { %22 = dma.hbm_to_vmem [thread:$0]  %s538_s0, 2048, %s398_s15, [#allocation3], %s374_s24, %s374_s24, %s375_s25  }
  0x23   :  { %s376_s10 = smov [#allocation7]   ;;  %s322_s14 = scalar_lea.hbm %s540_s2, 2048 }
  0x24   :  { %s40_s11 = sshll.u32 %s376_s10, 4  ;;  %p323_p2 = scmp.ne.s32.totalorder %s540_s2, %s322_s14  ;;  %s41_s11 = int_to_ptr.vmem [resolvable:$true] %s40_s11 }
  0x25   :  { %p326_p3 = scmp.lt.u32.totalorder %s322_s14, %s540_s2 }
  0x27   :  { %p328_p4 = pnand %p326_p3, %p323_p2 }
  0x29   :  { %331 = shalt.err (!%p328_p4)
}
  0x2a   :  { %s332_s20 = scalar_lea.vmem %s41_s11, 2048  ;;  %p337_p6 = scmp.lt.s32.totalorder %s41_s11, %s41_s11 }
  0x2b   :  { %p333_p5 = scmp.ne.s32.totalorder %s41_s11, %s332_s20  ;;  %p338_p7 = scmp.lt.s32.totalorder %s332_s20, %s332_s20 }
  0x2d   :  { %p339_p8 = por %p338_p7, %p337_p6 }
  0x2f   :  { %p340_p9 = pnand %p339_p8, %p333_p5 }
  0x31   :  { %343 = shalt.err (!%p340_p9)
}
  0x32   :  { %46 = dma.hbm_to_vmem [thread:$0]  %s540_s2, 2048, %s41_s11, [#allocation6], %s374_s24, %s374_s24, %s375_s25  }
  0x33   :  { %366 = dma.done.wait [#allocation3], 2048  }
  0x34   :  { %367 = vsyncadd [#allocation3], 4294965248 }
  0x35   :  { %368 = dma.done.wait [#allocation6], 4096  }
  0x36   :  { %369 = vsyncadd [#allocation6], 4294963200  ;;  %v77_v0 = vld [vmem:[#allocation5] sm:$0xff]  ;;  %v62_v2 = vld [vmem:[#allocation2 + $0x8] sm:$0xff]  ;;  %s377_s2 = smov [#allocation8]  }
  0x37   :  { %v61_v1 = vld [vmem:[#allocation2] sm:$0xff]  ;;  %v78_v3 = vld [vmem:[#allocation5 + $0x8] sm:$0xff]  ;;  %v63_v4 = vld [vmem:[#allocation2 + $0x10] sm:$0xff]  ;;  %s261_s21 = sshll.u32 %s377_s2, 4  ;;  %s262_s21 = int_to_ptr.vmem [resolvable:$true] %s261_s21 }
  0x38   :  { %v79_v5 = vld [vmem:[#allocation5 + $0x10] sm:$0xff]  ;;  %v80_v6 = vld [vmem:[#allocation5 + $0x18] sm:$0xff]  ;;  %v65_v8 = vld [vmem:[#allocation2 + $0x20] sm:$0xff]  ;;  %v109_v13 = vsub.f32 %v61_v1, %v77_v0  ;;  %v110_v20 = vsub.f32 %v62_v2, %v78_v3  ;;  %s344_s22 = scalar_lea.vmem %s262_s21, 128  ;;  %p349_p11 = scmp.lt.s32.totalorder %s262_s21, %s262_s21 }
  0x39   :  { %v64_v7 = vld [vmem:[#allocation2 + $0x18] sm:$0xff]  ;;  %v450_v9 = vld [vmem:[#allocation2 + $0x28] sm:$0xff]  ;;  %v81_v10 = vld [vmem:[#allocation5 + $0x20] sm:$0xff]  ;;  %v111_v27 = vsub.f32 %v63_v4, %v79_v5  ;;  %p345_p10 = scmp.ne.s32.totalorder %s262_s21, %s344_s22  ;;  %p350_p12 = scmp.lt.s32.totalorder %s344_s22, %s344_s22 }
  0x3a   :  { %v82_v11 = vld [vmem:[#allocation5 + $0x28] sm:$0xff]  ;;  %v83_v12 = vld [vmem:[#allocation5 + $0x30] sm:$0xff]  ;;  %v68_v15 = vld [vmem:[#allocation2 + $0x38] sm:$0xff]  ;;  %v112_v33 = vsub.f32 %v64_v7, %v80_v6  ;;  %v113_v34 = vsub.f32 %v65_v8, %v81_v10  ;;  %v461_v44 = vmul.f32 %v109_v13, %v109_v13  ;;  %v469_v51 = vmul.f32 %v110_v20, %v110_v20 }
  0x3b   :  { %v67_v14 = vld [vmem:[#allocation2 + $0x30] sm:$0xff]  ;;  %v69_v16 = vld [vmem:[#allocation2 + $0x40] sm:$0xff]  ;;  %v84_v17 = vld [vmem:[#allocation5 + $0x38] sm:$0xff]  ;;  %v453_v35 = vsub.f32 %v450_v9, %v82_v11  ;;  %v475_v58 = vmul.f32 %v111_v27, %v111_v27  ;;  %p351_p13 = por %p350_p12, %p349_p11 }
  0x3c   :  { %v85_v18 = vld [vmem:[#allocation5 + $0x40] sm:$0xff]  ;;  %v86_v19 = vld [vmem:[#allocation5 + $0x48] sm:$0xff]  ;;  %v71_v22 = vld [vmem:[#allocation2 + $0x50] sm:$0xff]  ;;  %v455_v41 = vsub.f32 %v67_v14, %v83_v12  ;;  %v457_v42 = vsub.f32 %v68_v15, %v84_v17  ;;  %v481_v12 = vmul.f32 %v112_v33, %v112_v33  ;;  %v483_v13 = vmul.f32 %v113_v34, %v113_v34 }
  0x3d   :  { %v70_v21 = vld [vmem:[#allocation2 + $0x48] sm:$0xff]  ;;  %v72_v23 = vld [vmem:[#allocation2 + $0x58] sm:$0xff]  ;;  %v87_v24 = vld [vmem:[#allocation5 + $0x50] sm:$0xff]  ;;  %v459_v43 = vsub.f32 %v69_v16, %v85_v18  ;;  %p352_p0 = pnand %p351_p13, %p345_p10 }
  0x3e   :  { %v88_v25 = vld [vmem:[#allocation5 + $0x58] sm:$0xff]  ;;  %v89_v26 = vld [vmem:[#allocation5 + $0x60] sm:$0xff]  ;;  %v74_v29 = vld [vmem:[#allocation2 + $0x68] sm:$0xff]  ;;  %v463_v48 = vsub.f32 %v70_v21, %v86_v19  ;;  %v465_v49 = vsub.f32 %v71_v22, %v87_v24 }
  0x3f   :  { %v73_v28 = vld [vmem:[#allocation2 + $0x60] sm:$0xff]  ;;  %v90_v30 = vld [vmem:[#allocation5 + $0x68] sm:$0xff]  ;;  %v91_v31 = vld [vmem:[#allocation5 + $0x70] sm:$0xff]  ;;  %v467_v50 = vsub.f32 %v72_v23, %v88_v25 }
  0x40   :  { %v93_v32 = vld [vmem:[#allocation7] sm:$0xff]  ;;  %v75_v36 = vld [vmem:[#allocation2 + $0x70] sm:$0xff]  ;;  %v76_v37 = vld [vmem:[#allocation2 + $0x78] sm:$0xff]  ;;  %v471_v55 = vsub.f32 %v73_v28, %v89_v26  ;;  %v473_v56 = vsub.f32 %v74_v29, %v90_v30 }
  0x41   :  { %v92_v38 = vld [vmem:[#allocation5 + $0x78] sm:$0xff]  ;;  %v94_v39 = vld [vmem:[#allocation7 + $0x8] sm:$0xff]  ;;  %v95_v40 = vld [vmem:[#allocation7 + $0x10] sm:$0xff]  ;;  %v125_v57 = vsub.f32 %v61_v1, %v93_v32  ;;  %v477_v62 = vsub.f32 %v75_v36, %v91_v31 }
  0x42   :  { %v96_v45 = vld [vmem:[#allocation7 + $0x18] sm:$0xff]  ;;  %v97_v46 = vld [vmem:[#allocation7 + $0x20] sm:$0xff]  ;;  %v98_v47 = vld [vmem:[#allocation7 + $0x28] sm:$0xff]  ;;  %v479_v63 = vsub.f32 %v76_v37, %v92_v38  ;;  %v126_v0 = vsub.f32 %v62_v2, %v94_v39  ;;  %v127_v3 = vsub.f32 %v63_v4, %v95_v40 }
  0x43   :  { %v99_v52 = vld [vmem:[#allocation7 + $0x30] sm:$0xff]  ;;  %v100_v53 = vld [vmem:[#allocation7 + $0x38] sm:$0xff]  ;;  %v101_v54 = vld [vmem:[#allocation7 + $0x40] sm:$0xff]  ;;  %v128_v10 = vsub.f32 %v64_v7, %v96_v45  ;;  %v129_v11 = vsub.f32 %v65_v8, %v97_v46  ;;  %v130_v18 = vsub.f32 %v450_v9, %v98_v47  ;;  %vm141_vm0 = vcmp.gt.f32.partialorder %v125_v57, 0.0 }
  0x44   :  { %v102_v59 = vld [vmem:[#allocation7 + $0x48] sm:$0xff]  ;;  %v103_v60 = vld [vmem:[#allocation7 + $0x50] sm:$0xff]  ;;  %v104_v61 = vld [vmem:[#allocation7 + $0x58] sm:$0xff]  ;;  %v131_v19 = vsub.f32 %v67_v14, %v99_v52  ;;  %v132_v20 = vsub.f32 %v68_v15, %v100_v53  ;;  %v133_v24 = vsub.f32 %v69_v16, %v101_v54  ;;  %vm142_vm1 = vcmp.gt.f32.partialorder %v126_v0, 0.0 }
  0x45   :  { %v105_v5 = vld [vmem:[#allocation7 + $0x60] sm:$0xff]  ;;  %v106_v6 = vld [vmem:[#allocation7 + $0x68] sm:$0xff]  ;;  %v107_v1 = vld [vmem:[#allocation7 + $0x70] sm:$0xff]  ;;  %v134_v25 = vsub.f32 %v70_v21, %v102_v59  ;;  %v135_v26 = vsub.f32 %v71_v22, %v103_v60  ;;  %v136_v27 = vsub.f32 %v72_v23, %v104_v61  ;;  %vm143_vm2 = vcmp.gt.f32.partialorder %v127_v3, 0.0 }
  0x46   :  { %v108_v17 = vld [vmem:[#allocation7 + $0x78] sm:$0xff]  ;;  %v137_v2 = vsub.f32 %v73_v28, %v105_v5  ;;  %v138_v4 = vsub.f32 %v74_v29, %v106_v6  ;;  %v139_v7 = vsub.f32 %v75_v36, %v107_v1  ;;  %vm144_vm3 = vcmp.gt.f32.partialorder %v128_v10, 0.0 }
  0x47   :  { %v140_v8 = vsub.f32 %v76_v37, %v108_v17  ;;  %vm145_vm4 = vcmp.gt.f32.partialorder %v129_v11, 0.0  ;;  %vm146_vm5 = vcmp.gt.f32.partialorder %v130_v18, 0.0  ;;  %vm147_vm6 = vcmp.gt.f32.partialorder %v131_v19, 0.0 }
  0x48   :  { %vm148_vm7 = vcmp.gt.f32.partialorder %v132_v20, 0.0  ;;  %vm149_vm8 = vcmp.gt.f32.partialorder %v133_v24, 0.0  ;;  %vm150_vm9 = vcmp.gt.f32.partialorder %v134_v25, 0.0  ;;  %vm151_vm10 = vcmp.gt.f32.partialorder %v135_v26, 0.0 }
  0x49   :  { %vm152_vm11 = vcmp.gt.f32.partialorder %v136_v27, 0.0  ;;  %v157_v9 = vsel %vm141_vm0, %v125_v57, 0.0  ;;  %vm153_vm12 = vcmp.gt.f32.partialorder %v137_v2, 0.0  ;;  %v158_v14 = vsel %vm142_vm1, %v126_v0, 0.0 }
  0x4a   :  { %v159_v15 = vsel %vm143_vm2, %v127_v3, 0.0  ;;  %v160_v16 = vsel %vm144_vm3, %v128_v10, 0.0  ;;  %vm154_vm13 = vcmp.gt.f32.partialorder %v138_v4, 0.0  ;;  %vm155_vm14 = vcmp.gt.f32.partialorder %v139_v7, 0.0 }
  0x4b   :  { %vm156_vm15 = vcmp.gt.f32.partialorder %v140_v8, 0.0  ;;  %v161_v21 = vsel %vm145_vm4, %v129_v11, 0.0  ;;  %v162_v22 = vsel %vm146_vm5, %v130_v18, 0.0  ;;  %v163_v23 = vsel %vm147_vm6, %v131_v19, 0.0 }
  0x4c   :  { %v164_v28 = vsel %vm148_vm7, %v132_v20, 0.0  ;;  %v189_v29 = vmul.f32 %v157_v9, %v157_v9  ;;  %v165_v30 = vsel %vm149_vm8, %v133_v24, 0.0  ;;  %v190_v31 = vmul.f32 %v158_v14, %v158_v14 }
  0x4d   :  { %v191_v32 = vmul.f32 %v159_v15, %v159_v15  ;;  %v192_v33 = vmul.f32 %v160_v16, %v160_v16  ;;  %v166_v34 = vsel %vm150_vm9, %v134_v25, 0.0  ;;  %v167_v36 = vsel %vm151_vm10, %v135_v26, 0.0 }
  0x4e   :  { %v168_v37 = vsel %vm152_vm11, %v136_v27, 0.0  ;;  %v193_v38 = vmul.f32 %v161_v21, %v161_v21  ;;  %v169_v39 = vsel %vm153_vm12, %v137_v2, 0.0  ;;  %v170_v40 = vsel %vm154_vm13, %v138_v4, 0.0 }
  0x4f   :  { %v171_v45 = vsel %vm155_vm14, %v139_v7, 0.0  ;;  %v194_v46 = vmul.f32 %v162_v22, %v162_v22  ;;  %v172_v47 = vsel %vm156_vm15, %v140_v8, 0.0  ;;  %v178_v52 = vmul.f32 %v453_v35, %v453_v35 }
  0x50   :  { %v195_v53 = vmul.f32 %v163_v23, %v163_v23  ;;  %v205_v54 = vmul.f32 0.5, %v189_v29  ;;  %v196_v57 = vmul.f32 %v164_v28, %v164_v28  ;;  %v206_v59 = vmul.f32 0.5, %v190_v31 }
  0x51   :  { %v207_v60 = vmul.f32 0.5, %v191_v32  ;;  %v208_v61 = vmul.f32 0.5, %v192_v33  ;;  %v179_v0 = vmul.f32 %v455_v41, %v455_v41  ;;  %v180_v3 = vmul.f32 %v457_v42, %v457_v42 }
  0x52   :  { %v197_v5 = vmul.f32 %v165_v30, %v165_v30  ;;  %v209_v6 = vmul.f32 0.5, %v193_v38  ;;  %v181_v10 = vmul.f32 %v459_v43, %v459_v43  ;;  %v182_v35 = vmul.f32 %v463_v48, %v463_v48 }
  0x53   :  { %v198_v11 = vmul.f32 %v166_v34, %v166_v34  ;;  %v210_v1 = vmul.f32 0.5, %v194_v46  ;;  %v199_v17 = vmul.f32 %v167_v36, %v167_v36  ;;  %v200_v18 = vmul.f32 %v168_v37, %v168_v37 }
  0x54   :  { %v211_v19 = vmul.f32 0.5, %v195_v53  ;;  %v221_v20 = vadd.f32 %v205_v54, %v461_v44  ;;  %v212_v24 = vmul.f32 0.5, %v196_v57  ;;  %v222_v41 = vadd.f32 %v206_v59, %v469_v51 }
  0x55   :  { %v223_v42 = vadd.f32 %v207_v60, %v475_v58  ;;  %v224_v25 = vadd.f32 %v208_v61, %v481_v12  ;;  %v183_v43 = vmul.f32 %v465_v49, %v465_v49  ;;  %v201_v26 = vmul.f32 %v169_v39, %v169_v39 }
  0x56   :  { %v213_v27 = vmul.f32 0.5, %v197_v5  ;;  %v225_v48 = vadd.f32 %v209_v6, %v483_v13  ;;  %v184_v2 = vmul.f32 %v467_v50, %v467_v50  ;;  %v202_v4 = vmul.f32 %v170_v40, %v170_v40 }
  0x57   :  { %v214_v7 = vmul.f32 0.5, %v198_v11  ;;  %v226_v44 = vadd.f32 %v210_v1, %v178_v52  ;;  %v203_v8 = vmul.f32 %v171_v45, %v171_v45  ;;  %v215_v9 = vmul.f32 0.5, %v199_v17 }
  0x58   :  { %v227_v51 = vadd.f32 %v211_v19, %v179_v0  ;;  %v237_v14 = vadd.f32 %v223_v42, %v221_v20  ;;  %v204_v58 = vmul.f32 %v172_v47, %v172_v47  ;;  %v216_v15 = vmul.f32 0.5, %v200_v18 }
  0x59   :  { %v228_v12 = vadd.f32 %v212_v24, %v180_v3  ;;  %v244_v16 = vadd.f32 %v224_v25, %v222_v41  ;;  %v185_v49 = vmul.f32 %v471_v55, %v471_v55  ;;  %v217_v21 = vmul.f32 0.5, %v201_v26 }
  0x5a   :  { %v229_v22 = vadd.f32 %v213_v27, %v181_v10  ;;  %v238_v13 = vadd.f32 %v237_v14, %v225_v48  ;;  %v186_v50 = vmul.f32 %v473_v56, %v473_v56  ;;  %v218_v23 = vmul.f32 0.5, %v202_v4 }
  0x5b   :  { %v230_v28 = vadd.f32 %v214_v7, %v182_v35  ;;  %v245_v29 = vadd.f32 %v244_v16, %v226_v44  ;;  %v187_v30 = vmul.f32 %v477_v62, %v477_v62  ;;  %v219_v31 = vmul.f32 0.5, %v203_v8 }
  0x5c   :  { %v231_v32 = vadd.f32 %v215_v9, %v183_v43  ;;  %v239_v33 = vadd.f32 %v238_v13, %v227_v51  ;;  %v188_v34 = vmul.f32 %v479_v63, %v479_v63  ;;  %v220_v36 = vmul.f32 0.5, %v204_v58 }
  0x5d   :  { %v232_v55 = vadd.f32 %v216_v15, %v184_v2  ;;  %v246_v37 = vadd.f32 %v245_v29, %v228_v12  ;;  %v233_v38 = vadd.f32 %v217_v21, %v185_v49  ;;  %v234_v40 = vadd.f32 %v218_v23, %v186_v50 }
  0x5e   :  { %v240_v39 = vadd.f32 %v239_v33, %v229_v22  ;;  %v235_v56 = vadd.f32 %v219_v31, %v187_v30  ;;  %v236_v47 = vadd.f32 %v220_v36, %v188_v34 }
  0x5f   :  { %v247_v45 = vadd.f32 %v246_v37, %v230_v28 }
  0x60   :  { %v241_v46 = vadd.f32 %v240_v39, %v231_v32 }
  0x61   :  { %v248_v52 = vadd.f32 %v247_v45, %v232_v55 }
  0x62   :  { %v242_v53 = vadd.f32 %v241_v46, %v233_v38 }
  0x63   :  { %v249_v54 = vadd.f32 %v248_v52, %v234_v40 }
  0x64   :  { %v243_v62 = vadd.f32 %v242_v53, %v235_v56 }
  0x65   :  { %v250_v57 = vadd.f32 %v249_v54, %v236_v47 }
  0x67   :  { %v251_v59 = vadd.f32 %v250_v57, %v243_v62 }
  0x69   :  { %254 = vst [vmem:[#allocation8] sm:$0xff] %v251_v59 }
  0x6a   :  { %355 = shalt.err (!%p352_p0)
}
  0x6b   :  { %s356_s25 = scalar_lea.hbm %s541_s3, 128 }
  0x6c   :  { %p357_p1 = scmp.ne.s32.totalorder %s541_s3, %s356_s25  ;;  %p360_p2 = scmp.lt.u32.totalorder %s356_s25, %s541_s3 }
  0x6e   :  { %p362_p3 = pnand %p360_p2, %p357_p1 }
  0x70   :  { %365 = shalt.err (!%p362_p3)
}
  0x71   :  { %264 = dma.vmem_to_hbm [thread:$0]  %s262_s21, 128, %s541_s3, [#allocation4]  }
  0x72   :  { %370 = dma.done.wait [#allocation4], 128  }
  0x73   :  { %371 = vsyncadd [#allocation4], 4294967168 }
  0x74   :  { %268 = vsyncpa [#allocation3], 1 }
  0x75   :  { %269 = vsyncpa [#allocation6], 1 }
  0x76   :  { %270 = vsyncpa [#allocation4], 1 }

</bundles_post_ra>
